<compile_context>
chip_gen: v7x
topology: tpu7x:2x2x1
jax: 0.10.0
libtpu: 0.0.40
codegen_flags: <defaults>
</compile_context>

<pallas_src>
import functools

import jax
import jax.numpy as jnp
from jax.experimental import pallas as pl
from jax.experimental.pallas import tpu as pltpu


def _round_up(x, m):
    return ((x + m - 1) // m) * m


def _maybe_pad2d(a, rows, cols):
    r, c = a.shape
    if r == rows and c == cols:
        return a                      # no extra HBM pass when already aligned
    return jnp.pad(a, ((0, rows - r), (0, cols - c)))


# ----------------------------- kernels --------------------------------------

def _collapsed_kernel(x_ref, w_ref, b_ref, o_ref, *, compute_dtype):
    # Whole-K block: single MXU dot + f32 bias add per (i, j) tile.
    acc = jnp.dot(x_ref[...].astype(compute_dtype), w_ref[...],
                  preferred_element_type=jnp.float32)
    o_ref[...] = (acc + b_ref[...]).astype(o_ref.dtype)


def _ktiled_f32out_kernel(x_ref, w_ref, b_ref, o_ref, *, compute_dtype):
    # Large-K path, f32 output: accumulate directly into the resident output
    # block (its block index is constant across k), no scratch needed.
    k = pl.program_id(2)

    @pl.when(k == 0)
    def _init():
        o_ref[...] = jnp.broadcast_to(b_ref[...], o_ref.shape)

    o_ref[...] += jnp.dot(x_ref[...].astype(compute_dtype), w_ref[...],
                          preferred_element_type=jnp.float32)


def _ktiled_scratch_kernel(x_ref, w_ref, b_ref, o_ref, acc_ref, *,
                           compute_dtype):
    # Large-K path, non-f32 output: f32 VMEM accumulator + finalize.
    k = pl.program_id(2)

    @pl.when(k == 0)
    def _init():
        acc_ref[...] = jnp.zeros_like(acc_ref)

    acc_ref[...] += jnp.dot(x_ref[...].astype(compute_dtype), w_ref[...],
                            preferred_element_type=jnp.float32)

    @pl.when(k == pl.num_programs(2) - 1)
    def _finalize():
        o_ref[...] = (acc_ref[...] + b_ref[...]).astype(o_ref.dtype)


# ----------------------------- wrapper ---------------------------------------

def conv1d_rf1(x, w, b, *, tm=256, tn=1024, tk=1024, k_collapse=4096,
               use_bf16=True):
    """Pallas equivalent of Conv1D(out_dim, rf=1, in_dim).forward(x).

    x: (..., in_dim)   w: (in_dim, out_dim)   b: (out_dim,)
    returns: (..., out_dim) in x.dtype

    use_bf16=True feeds the MXU bf16 inputs (f32 accumulation, f32 bias);
    use_bf16=False keeps the full-precision path for validation.
    """
    *lead, K = x.shape
    Kw, N = w.shape
    assert Kw == K, "weight/input contraction-dim mismatch"
    x2 = x.reshape(-1, K)                       # torch: x.view(-1, x.size(-1))
    M = x2.shape[0]

    out_dtype = x.dtype
    compute_dtype = jnp.bfloat16 if use_bf16 else x.dtype

    x_item = jnp.dtype(x.dtype).itemsize        # x kept as-is; cast per-tile
    w_item = jnp.dtype(compute_dtype).itemsize
    out_item = jnp.dtype(out_dtype).itemsize

    # ---- tile selection --------------------------------------------------
    m_align = 16 if jnp.dtype(compute_dtype).itemsize == 2 else 8
    tm_e = _round_up(min(tm, _round_up(M, m_align)), m_align)

    Kp128 = _round_up(K, 128)
    collapsed = Kp128 <= k_collapse
    tk_e = Kp128 if collapsed else _round_up(min(tk, Kp128), 128)

    tn_e = _round_up(min(tn, _round_up(N, 128)), 128)

    def tile_bytes(tm_, tn_, tk_):
        t = 2 * (tm_ * tk_ * x_item          # x (double-buffered, orig dtype)
                 + tk_ * tn_ * w_item        # w (double-buffered)
                 + tm_ * tn_ * out_item      # out (double-buffered)
                 + tn_ * 4)                  # bias
        if (not collapsed) and out_dtype != jnp.float32:
            t += tm_ * tn_ * 4               # accumulator scratch
        return t

    VMEM_BUDGET = 36 * 1024 * 1024           # conservative: fits v7x (64 MiB)
    while tile_bytes(tm_e, tn_e, tk_e) > VMEM_BUDGET and tn_e > 128:
        tn_e = max(128, (tn_e // 2) // 128 * 128)
    while tile_bytes(tm_e, tn_e, tk_e) > VMEM_BUDGET and tm_e > m_align:
        tm_e = max(m_align, _round_up(tm_e // 2, m_align))
    while (not collapsed) and tile_bytes(tm_e, tn_e, tk_e) > VMEM_BUDGET \
            and tk_e > 128:
        tk_e = max(128, (tk_e // 2) // 128 * 128)

    Mp = _round_up(M, tm_e)
    Np = _round_up(N, tn_e)
    Kp = Kp128 if collapsed else _round_up(K, tk_e)

    grid_m = Mp // tm_e
    grid_n = Np // tn_e

    # v7x has 2 TensorCores: make sure at least one "parallel" axis has >= 2
    # blocks when the problem allows it (no-op on 1-TC v5e/v6e).
    if grid_m == 1 and grid_n == 1 and tn_e % 256 == 0:
        tn_e //= 2
        grid_n = Np // tn_e

    grid_k = 1 if collapsed else Kp // tk_e

    # ---- conditional padding / casts (skipped entirely when aligned) ------
    xp = _maybe_pad2d(x2, Mp, Kp)                        # original dtype
    wp = _maybe_pad2d(w.astype(compute_dtype), Kp, Np)   # params are small
    if Np == N:
        bp = b.astype(jnp.float32).reshape(1, Np)
    else:
        bp = jnp.pad(b.astype(jnp.float32), (0, Np - N)).reshape(1, Np)

    # ---- cost estimate (includes re-read factors) --------------------------
    flops = 2 * Mp * Np * Kp
    bytes_accessed = (Mp * Kp * x_item * grid_n       # x streamed once per j
                      + Kp * Np * w_item * grid_m     # w streamed once per i
                      + Np * 4
                      + Mp * Np * out_item)
    cost = pl.CostEstimate(flops=flops, transcendentals=0,
                           bytes_accessed=bytes_accessed)

    vmem_needed = tile_bytes(tm_e, tn_e, tk_e)
    vmem_limit = 48 * 1024 * 1024 if vmem_needed > 12 * 1024 * 1024 else None

    # ---- grid / specs ------------------------------------------------------
    if collapsed:
        kernel = functools.partial(_collapsed_kernel,
                                   compute_dtype=compute_dtype)
        grid = (grid_m, grid_n)
        in_specs = [
            pl.BlockSpec((tm_e, Kp), lambda i, j: (i, 0)),     # x tile
            pl.BlockSpec((Kp, tn_e), lambda i, j: (0, j)),     # w tile
            pl.BlockSpec((1, tn_e), lambda i, j: (0, j)),      # bias
        ]
        out_specs = pl.BlockSpec((tm_e, tn_e), lambda i, j: (i, j))
        scratch_shapes = []
        dim_sem = ("parallel", "parallel")
    else:
        grid = (grid_m, grid_n, grid_k)                        # K last
        in_specs = [
            pl.BlockSpec((tm_e, tk_e), lambda i, j, k: (i, k)),
            pl.BlockSpec((tk_e, tn_e), lambda i, j, k: (k, j)),
            pl.BlockSpec((1, tn_e), lambda i, j, k: (0, j)),
        ]
        out_specs = pl.BlockSpec((tm_e, tn_e), lambda i, j, k: (i, j))
        dim_sem = ("parallel", "parallel", "arbitrary")
        if out_dtype == jnp.float32:
            kernel = functools.partial(_ktiled_f32out_kernel,
                                       compute_dtype=compute_dtype)
            scratch_shapes = []
        else:
            kernel = functools.partial(_ktiled_scratch_kernel,
                                       compute_dtype=compute_dtype)
            scratch_shapes = [pltpu.VMEM((tm_e, tn_e), jnp.float32)]

    out = pl.pallas_call(
        kernel,
        out_shape=jax.ShapeDtypeStruct((Mp, Np), out_dtype),
        grid_spec=pltpu.PrefetchScalarGridSpec(
            num_scalar_prefetch=0,
            grid=grid,
            in_specs=in_specs,
            out_specs=out_specs,
            scratch_shapes=scratch_shapes,
        ),
        compiler_params=pltpu.CompilerParams(
            dimension_semantics=dim_sem,
            vmem_limit_bytes=vmem_limit),
        cost_estimate=cost,
    )(xp, wp, bp)

    if Mp != M or Np != N:
        out = out[:M, :N]
    return out.reshape(*lead, N)                # torch: x.view(*size_out)


def _ref(x, w, b):
    *lead, K = x.shape
    y = jnp.dot(x.reshape(-1, K).astype(jnp.float32), w.astype(jnp.float32),
                precision=jax.lax.Precision.HIGHEST) + b.astype(jnp.float32)
    return y.reshape(*lead, w.shape[1])


if __name__ == "__main__":
    # Conv1D.__init__ (rf == 1): w ~ Normal(0, 0.02) of shape (in_dim, out_dim),
    # b = zeros(out_dim).  Small shapes consistent with the module's usage.
    in_dim, out_dim = 32, 64
    batch, seq = 2, 8

    key = jax.random.PRNGKey(0)
    kx, kw = jax.random.split(key)
    x = jax.random.normal(kx, (batch, seq, in_dim), dtype=jnp.float32)
    w = 0.02 * jax.random.normal(kw, (in_dim, out_dim), dtype=jnp.float32)
    b = jnp.zeros((out_dim,), dtype=jnp.float32)

    y_ref = _ref(x, w, b)

    # 1) Default bf16-fed MXU path (collapsed K, single grid step).
    y_bf16 = conv1d_rf1(x, w, b, use_bf16=True)
    jax.block_until_ready(y_bf16)
    assert y_bf16.shape == (batch, seq, out_dim)
    assert jnp.allclose(y_bf16, y_ref, atol=2e-2, rtol=2e-2)

    # 1b) f32 path for tight validation.
    y_f32 = conv1d_rf1(x, w, b, use_bf16=False)
    jax.block_until_ready(y_f32)
    assert jnp.allclose(y_f32, y_ref, atol=1e-4, rtol=1e-4)

    # 2) Collapsed-K path, fully tile-aligned shapes (no pad, no output slice),
    #    2x2 (i, j) grid.
    K1, N1 = 128, 256
    kx1, kw1, kb1 = jax.random.split(jax.random.PRNGKey(1), 3)
    x1 = jax.random.normal(kx1, (2, 128, K1), dtype=jnp.float32)
    w1 = 0.02 * jax.random.normal(kw1, (K1, N1), dtype=jnp.float32)
    b1 = 0.1 * jax.random.normal(kb1, (N1,), dtype=jnp.float32)
    y1 = conv1d_rf1(x1, w1, b1, tm=128, tn=128, use_bf16=True)
    jax.block_until_ready(y1)
    assert jnp.allclose(y1, _ref(x1, w1, b1), atol=2e-2, rtol=2e-2)

    # 3) Forced K-tiled path (grid_k > 1), padding on every axis, f32 output
    #    (accumulate-into-output kernel), tight tolerance.
    K2, N2 = 160, 192
    kx2, kw2, kb2 = jax.random.split(jax.random.PRNGKey(2), 3)
    x2 = jax.random.normal(kx2, (4, 72, K2), dtype=jnp.float32)
    w2 = 0.02 * jax.random.normal(kw2, (K2, N2), dtype=jnp.float32)
    b2 = 0.1 * jax.random.normal(kb2, (N2,), dtype=jnp.float32)
    y2_ref = _ref(x2, w2, b2)
    y2 = conv1d_rf1(x2, w2, b2, tm=64, tn=128, tk=128, k_collapse=128,
                    use_bf16=False)
    jax.block_until_ready(y2)
    assert jnp.allclose(y2, y2_ref, atol=1e-4, rtol=1e-4)

    # 4) Forced K-tiled path with bf16 input/output (scratch-accumulator kernel).
    y3 = conv1d_rf1(x2.astype(jnp.bfloat16), w2, b2, tm=64, tn=128, tk=128,
                    k_collapse=128, use_bf16=True)
    jax.block_until_ready(y3)
    assert y3.dtype == jnp.bfloat16
    assert jnp.allclose(y3.astype(jnp.float32), y2_ref, atol=5e-2, rtol=5e-2)

    print("KERNEL_OK")
</pallas_src>

<mosaic_0001>
module attributes {stable_mosaic.version = 11 : i64} {
  func.func @_collapsed_kernel(%arg0: i32, %arg1: i32, %arg2: memref<16x128xf32, #tpu.memory_space<vmem>>, %arg3: memref<128x128xbf16, #tpu.memory_space<vmem>>, %arg4: memref<1x128xf32, #tpu.memory_space<vmem>>, %arg5: memref<16x128xf32, #tpu.memory_space<vmem>>) attributes {dimension_semantics = [#tpu.dimension_semantics<parallel>, #tpu.dimension_semantics<parallel>], iteration_bounds = array<i64: 1, 1>, scalar_prefetch = 0 : i64, scratch_operands = 0 : i64, tpu.core_type = #tpu.core_type<tc>, window_params = [{transform_indices = @transform_0, window_bounds = array<i64: 16, 128>}, {transform_indices = @transform_1, window_bounds = array<i64: 128, 128>}, {transform_indices = @transform_2, window_bounds = array<i64: 1, 128>}, {transform_indices = @transform_3, window_bounds = array<i64: 16, 128>}]} {
    %c0 = arith.constant 0 : index
    %c0_0 = arith.constant 0 : index
    %0 = vector.load %arg2[%c0, %c0_0] : memref<16x128xf32, #tpu.memory_space<vmem>>, vector<16x128xf32>
    %1 = arith.truncf %0 : vector<16x128xf32> to vector<16x128xbf16>
    %c0_1 = arith.constant 0 : index
    %c0_2 = arith.constant 0 : index
    %2 = vector.load %arg3[%c0_1, %c0_2] : memref<128x128xbf16, #tpu.memory_space<vmem>>, vector<128x128xbf16>
    %cst = arith.constant dense<0.000000e+00> : vector<16x128xf32>
    %3 = tpu.matmul %1, %2, %cst {dimension_numbers = #tpu.dot_dimension_numbers<[1], [0], [0], [1], [0, 0, 1, 1], [], []>} : vector<16x128xbf16>, vector<128x128xbf16>, vector<16x128xf32> -> vector<16x128xf32>
    %c0_3 = arith.constant 0 : index
    %c0_4 = arith.constant 0 : index
    %4 = vector.load %arg4[%c0_3, %c0_4] : memref<1x128xf32, #tpu.memory_space<vmem>>, vector<1x128xf32>
    %5 = vector.broadcast %4 : vector<1x128xf32> to vector<16x128xf32>
    %6 = arith.addf %3, %5 : vector<16x128xf32>
    %c0_5 = arith.constant 0 : index
    %c0_6 = arith.constant 0 : index
    %7 = vector.load %arg5[%c0_5, %c0_6] : memref<16x128xf32, #tpu.memory_space<vmem>>, vector<16x128xf32>
    tpu.vector_store %arg5[%c0_5, %c0_6], %6 {strides = array<i32>} : memref<16x128xf32, #tpu.memory_space<vmem>>, vector<16x128xf32>,
    return
  }
  func.func @transform_0(%arg0: i32, %arg1: i32) -> (i32, i32) {
    %c0_i32 = arith.constant 0 : i32
    %c0_i32_0 = arith.constant 0 : i32
    return %arg0, %c0_i32 : i32, i32
  }
  func.func @transform_1(%arg0: i32, %arg1: i32) -> (i32, i32) {
    %c0_i32 = arith.constant 0 : i32
    %c0_i32_0 = arith.constant 0 : i32
    return %c0_i32, %arg1 : i32, i32
  }
  func.func @transform_2(%arg0: i32, %arg1: i32) -> (i32, i32) {
    %c0_i32 = arith.constant 0 : i32
    %c0_i32_0 = arith.constant 0 : i32
    return %c0_i32, %arg1 : i32, i32
  }
  func.func @transform_3(%arg0: i32, %arg1: i32) -> (i32, i32) {
    %c0_i32 = arith.constant 0 : i32
    return %arg0, %arg1 : i32, i32
  }
}

</mosaic_0001>

<bundles_post_ra>
// kernel: tpu_custom_call.1
= control target key start
LH: loop header
LB: loop body
LE: loop exit
PB: predicated region body
PF: predicated region fallthrough
CT: control target
= control target key end

     0   :  { %8 = vsyncpa [#allocation3], 0  ;;  %s380_s0 = inlined_call_operand.hbm [shape: f32[16,128], index: 0, kind: input, shape index: {}]   ;;  %s381_s1 = inlined_call_operand.hbm [shape: bf16[128,128], index: 1, kind: input, shape index: {}]   ;;  %s382_s2 = inlined_call_operand.vmem [shape: f32[1,128], index: 2, kind: input, shape index: {}]   ;;  %s383_s3 = inlined_call_operand.hbm [shape: f32[16,128], index: 3, kind: output, shape index: {}]  }
   0x1   :  { %9 = vsyncpa [#allocation6], 0 }
   0x2   :  { %10 = vsyncpa [#allocation4], 0  ;;  %s306_s12 = smov [#allocation2]   ;;  %s234_s16 = scalar_lea.hbm %s380_s0, 256 }
   0x3   :  { %s16_s13 = sshll.u32 %s306_s12, 4  ;;  %p235_p0 = scmp.ne.s32.totalorder %s380_s0, %s234_s16  ;;  %s17_s13 = int_to_ptr.vmem [resolvable:$true] %s16_s13 }
   0x4   :  { %p238_p1 = scmp.lt.u32.totalorder %s234_s16, %s380_s0 }
   0x6   :  { %p240_p2 = pnand %p238_p1, %p235_p0 }
   0x8   :  { %243 = shalt.err (!%p240_p2)
}
   0x9   :  { %s244_s21 = scalar_lea.vmem %s17_s13, 256  ;;  %p249_p4 = scmp.lt.s32.totalorder %s17_s13, %s17_s13 }
   0xa   :  { %p245_p3 = scmp.ne.s32.totalorder %s17_s13, %s244_s21  ;;  %p250_p5 = scmp.lt.s32.totalorder %s244_s21, %s244_s21 }
   0xc   :  { %p251_p6 = por %p250_p5, %p249_p4 }
   0xe   :  { %p252_p7 = pnand %p251_p6, %p245_p3 }
  0x10   :  { %255 = shalt.err (!%p252_p7)
}
  0x11   :  { %s307_s22 = smov 128   ;;  %s308_s23 = smov 8  }
  0x12   :  { %22 = dma.hbm_to_vmem [thread:$0]  %s380_s0, 256, %s17_s13, [#allocation3], %s307_s22, %s307_s22, %s308_s23  }
  0x13   :  { %s309_s26 = smov [#allocation5]   ;;  %s256_s30 = scalar_lea.hbm %s381_s1, 1024 }
  0x14   :  { %s28_s27 = sshll.u32 %s309_s26, 4  ;;  %p257_p8 = scmp.ne.s32.totalorder %s381_s1, %s256_s30  ;;  %s29_s27 = int_to_ptr.vmem [resolvable:$true] %s28_s27 }
  0x15   :  { %p260_p9 = scmp.lt.u32.totalorder %s256_s30, %s381_s1 }
  0x17   :  { %p262_p10 = pnand %p260_p9, %p257_p8 }
  0x19   :  { %265 = shalt.err (!%p262_p10)
}
  0x1a   :  { %s266_s8 = scalar_lea.vmem %s29_s27, 1024  ;;  %p271_p12 = scmp.lt.s32.totalorder %s29_s27, %s29_s27 }
  0x1b   :  { %p267_p11 = scmp.ne.s32.totalorder %s29_s27, %s266_s8  ;;  %p272_p13 = scmp.lt.s32.totalorder %s266_s8, %s266_s8 }
  0x1d   :  { %p273_p0 = por %p272_p13, %p271_p12 }
  0x1f   :  { %p274_p1 = pnand %p273_p0, %p267_p11 }
  0x21   :  { %277 = shalt.err (!%p274_p1)
}
  0x22   :  { %s310_s0 = smov 64   ;;  %s311_s9 = smov 4  }
  0x23   :  { %34 = dma.hbm_to_vmem [thread:$0]  %s381_s1, 1024, %s29_s27, [#allocation6], %s310_s0, %s310_s0, %s311_s9  }
  0x24   :  { %300 = dma.done.wait [#allocation3], 256  }
  0x25   :  { %301 = vsyncadd [#allocation3], 4294967040 }
  0x26   :  { %302 = dma.done.wait [#allocation6], 1024  }
  0x27   :  { %303 = vsyncadd [#allocation6], 4294966272  ;;  %v312_v0 = vmov 0.0   ;;  %vm313_vm0 = vmmov 0   ;;  %v226_v1 = vld [vmem:[#allocation5] sm:$0xff]   ;;  %v227_v2 = vld [vmem:[#allocation5 + $0x8] sm:$0xff]  }
  0x28   :  { %197 = vmatprep.subr.bf16.mxu0 %v312_v0  ;;  %213 = vmatprep.mubr.msk.bf16.mxu0 %vm313_vm0, %v312_v0  ;;  %v228_v3 = vld [vmem:[#allocation5 + $0x10] sm:$0xff]   ;;  %v229_v4 = vld [vmem:[#allocation5 + $0x18] sm:$0xff]   ;;  %v230_v5 = vld [vmem:[#allocation5 + $0x20] sm:$0xff]   ;;  %s314_s13 = smov [#allocation7]  }
  0x29   :  { %198 = vmatpush3.bf16.msra.mxu0 %v226_v1  ;;  %v231_v6 = vld [vmem:[#allocation5 + $0x28] sm:$0xff]   ;;  %v232_v7 = vld [vmem:[#allocation5 + $0x30] sm:$0xff]   ;;  %v233_v8 = vld [vmem:[#allocation5 + $0x38] sm:$0xff]   ;;  %s166_s14 = sshll.u32 %s314_s13, 4  ;;  %s167_s14 = int_to_ptr.vmem [resolvable:$true] %s166_s14 }
  0x2a   :  { %199 = vmatprep.subr.bf16.mxu0 %v312_v0  ;;  %v44_v9 = vld [vmem:[#allocation2] sm:$0xff]  ;;  %v45_v10 = vld [vmem:[#allocation2 + $0x8] sm:$0xff]  ;;  %s278_s15 = scalar_lea.vmem %s167_s14, 256  ;;  %p283_p3 = scmp.lt.s32.totalorder %s167_s14, %s167_s14 }
  0x2b   :  { %v46_v11 = vpack.c.bf16 %v45_v10, %v44_v9  ;;  %v179_v12 = vld [vmem:[%s382_s2] ss:$0 sm:$0xff]  ;;  %p279_p2 = scmp.ne.s32.totalorder %s167_s14, %s278_s15  ;;  %p284_p4 = scmp.lt.s32.totalorder %s278_s15, %s278_s15 }
  0x2d   :  { %200 = vmatpush3.bf16.msra.mxu0 %v227_v2  ;;  %p285_p5 = por %p284_p4, %p283_p3 }
  0x2e   :  { %201 = vmatprep.subr.bf16.mxu0 %v312_v0 }
  0x2f   :  { %p286_p6 = pnand %p285_p5, %p279_p2 }
  0x31   :  { %202 = vmatpush3.bf16.msra.mxu0 %v228_v3 }
  0x32   :  { %203 = vmatprep.subr.bf16.mxu0 %v312_v0 }
  0x35   :  { %204 = vmatpush3.bf16.msra.mxu0 %v229_v4 }
  0x36   :  { %205 = vmatprep.subr.bf16.mxu0 %v312_v0 }
  0x39   :  { %206 = vmatpush3.bf16.msra.mxu0 %v230_v5 }
  0x3a   :  { %207 = vmatprep.subr.bf16.mxu0 %v312_v0 }
  0x3d   :  { %208 = vmatpush3.bf16.msra.mxu0 %v231_v6 }
  0x3e   :  { %209 = vmatprep.subr.bf16.mxu0 %v312_v0 }
  0x41   :  { %210 = vmatpush3.bf16.msra.mxu0 %v232_v7 }
  0x42   :  { %211 = vmatprep.subr.bf16.mxu0 %v312_v0 }
  0x45   :  { %212 = vmatpush3.bf16.msra.mxu0 %v233_v8 }
  0x48   :  { %214 = vmatmul.mubr.bf16.vlgmr.msra.gmra.mrb[0].mxu0 %v46_v11 }
 0x11b   :  { %v152_v13 = vpop.f32.mrb[0].mxu0 }
 0x11c   :  { %v153_v14 = vadd.f32 %v179_v12, %v152_v13  ;;  %v215_v15 = vpop.f32.mrb[1].mxu0 }
 0x11d   :  { %v155_v16 = vpop.f32.mrb[2].mxu0 }
 0x11e   :  { %159 = vst [vmem:[#allocation7] sm:$0xff] %v153_v14  ;;  %v156_v17 = vadd.f32 %v179_v12, %v155_v16  ;;  %v216_v18 = vpop.f32.mrb[3].mxu0 }
 0x120   :  { %160 = vst [vmem:[#allocation7 + $0x8] sm:$0xff] %v156_v17 }
 0x121   :  { %289 = shalt.err (!%p286_p6)
}
 0x122   :  { %s290_s17 = scalar_lea.hbm %s383_s3, 256 }
 0x123   :  { %p291_p7 = scmp.ne.s32.totalorder %s383_s3, %s290_s17  ;;  %p294_p8 = scmp.lt.u32.totalorder %s290_s17, %s383_s3 }
 0x125   :  { %p296_p9 = pnand %p294_p8, %p291_p7 }
 0x127   :  { %299 = shalt.err (!%p296_p9)
}
 0x128   :  { %172 = dma.vmem_to_hbm [thread:$0]  %s167_s14, 256, %s383_s3, [#allocation4], %s307_s22, %s307_s22, %s308_s23  }
 0x129   :  { %304 = dma.done.wait [#allocation4], 256  }
 0x12a   :  { %305 = vsyncadd [#allocation4], 4294967040 }
 0x12b   :  { %176 = vsyncpa [#allocation3], 1 }
 0x12c   :  { %177 = vsyncpa [#allocation6], 1 }
 0x12d   :  { %178 = vsyncpa [#allocation4], 1 }

</bundles_post_ra>
